<compile_context>
chip_gen: v5e
topology: v5e:2x2
jax: 0.10.0
libtpu: 0.0.40
codegen_flags: <defaults>
</compile_context>

<pallas_src>
import jax
import jax.numpy as jnp
import numpy as np
from jax.experimental import pallas as pl
from jax.experimental.pallas import tpu as pltpu

IN_DIM = 48 * 4 * 4 * 2          # 1536
HID = 100
NCLS = 10
HID_PAD = 128                    # padded hidden / class width (lane multiple)
EPS = 1e-5
DEFAULT_TILE_B = 512             # batch tile (amortizes ~0.35us/step overhead)


def _round_up(x, m):
    return (x + m - 1) // m * m


def man_classifier_kernel(x_ref, w1_ref, t1_ref, w2_ref, t2_ref, w3_ref, b3_ref,
                          logits_ref, feat_ref):
    # fc1 (BN scale folded into w1 columns) + shift + ReLU.  Dropout == identity
    # in eval mode.
    x = x_ref[...].astype(jnp.bfloat16)
    h1 = jnp.dot(x, w1_ref[...], preferred_element_type=jnp.float32)
    h1 = jnp.maximum(h1 + t1_ref[...], 0.0)

    # fc2 (BN scale folded) + shift + ReLU  -> feature
    h2 = jnp.dot(h1.astype(jnp.bfloat16), w2_ref[...],
                 preferred_element_type=jnp.float32)
    h2 = jnp.maximum(h2 + t2_ref[...], 0.0)
    feat_ref[...] = h2

    # fc3 (classifier head) -> class logits (zero-padded to 128 lanes)
    logits_ref[...] = (jnp.dot(h2.astype(jnp.bfloat16), w3_ref[...],
                               preferred_element_type=jnp.float32)
                       + b3_ref[...])


def man_classifier_forward(x, params, tile_b=DEFAULT_TILE_B):
    """x: [B, 1536] float32.  Returns (class_output [B,10], feature [B,100])."""
    B = x.shape[0]
    (w1, t1, w2, t2, w3, b3) = params

    # Batch tile: multiple of 8 sublanes; don't over-tile tiny batches.
    tb = min(tile_b, _round_up(B, 8))
    B_pad = _round_up(B, tb)
    if B_pad != B:
        x = jnp.pad(x, ((0, B_pad - B), (0, 0)))
    grid = (B_pad // tb,)

    x_spec = pl.BlockSpec((tb, IN_DIM), lambda i: (i, 0))
    out_spec = pl.BlockSpec((tb, HID_PAD), lambda i: (i, 0))
    # Weights / shifts: constant index map -> fetched once, VMEM-resident
    # across the whole batch grid.
    pinned = lambda shape: pl.BlockSpec(shape, lambda i: (0, 0))

    logits_pad, feat_pad = pl.pallas_call(
        man_classifier_kernel,
        grid=grid,
        out_shape=(jax.ShapeDtypeStruct((B_pad, HID_PAD), jnp.float32),
                   jax.ShapeDtypeStruct((B_pad, HID_PAD), jnp.float32)),
        in_specs=[x_spec,
                  pinned(w1.shape), pinned(t1.shape),
                  pinned(w2.shape), pinned(t2.shape),
                  pinned(w3.shape), pinned(b3.shape)],
        out_specs=(out_spec, out_spec),
        compiler_params=pltpu.CompilerParams(
            dimension_semantics=("parallel",)),
    )(x, w1, t1, w2, t2, w3, b3)

    return logits_pad[:B, :NCLS], feat_pad[:B, :HID]


def _linear_init(key, fan_in, fan_out):
    # PyTorch default nn.Linear init: U(-1/sqrt(fan_in), 1/sqrt(fan_in))
    kw, kb = jax.random.split(key)
    bound = 1.0 / jnp.sqrt(fan_in)
    w = jax.random.uniform(kw, (fan_in, fan_out), jnp.float32, -bound, bound)
    b = jax.random.uniform(kb, (fan_out,), jnp.float32, -bound, bound)
    return w, b


def make_params(key):
    """Returns (kernel_params, raw_params).

    kernel_params: BN-folded, lane-padded, bf16 weights for the Pallas kernel.
    raw_params:    unfused f32 PyTorch-equivalent parameters (for reference).
    """
    k1, k2, k3 = jax.random.split(key, 3)
    w1, b1 = _linear_init(k1, IN_DIM, HID)
    w2, b2 = _linear_init(k2, HID, HID)
    w3, b3 = _linear_init(k3, HID, NCLS)

    # BatchNorm1d (fresh init, eval mode): gamma=1, beta=0, mean=0, var=1.
    # With trained stats the same fold formulas below remain correct.
    gamma1 = jnp.ones((HID,), jnp.float32); beta1 = jnp.zeros((HID,), jnp.float32)
    mean1 = jnp.zeros((HID,), jnp.float32); var1 = jnp.ones((HID,), jnp.float32)
    gamma2 = jnp.ones((HID,), jnp.float32); beta2 = jnp.zeros((HID,), jnp.float32)
    mean2 = jnp.zeros((HID,), jnp.float32); var2 = jnp.ones((HID,), jnp.float32)

    raw = dict(w1=w1, b1=b1, w2=w2, b2=b2, w3=w3, b3=b3,
               gamma1=gamma1, beta1=beta1, mean1=mean1, var1=var1,
               gamma2=gamma2, beta2=beta2, mean2=mean2, var2=var2)

    # Fold Linear bias + BN:
    #   bn(x@W + b) = x@(W*s) + ((b - mean)*s + beta),  s = gamma/sqrt(var+eps)
    s1 = gamma1 / jnp.sqrt(var1 + EPS)
    t1 = (b1 - mean1) * s1 + beta1
    s2 = gamma2 / jnp.sqrt(var2 + EPS)
    t2 = (b2 - mean2) * s2 + beta2

    w1f = w1 * s1[None, :]                 # BN scale folded into columns
    w2f = w2 * s2[None, :]

    # Zero-pad the 100-wide / 10-wide dims to 128 lanes.
    def pad_cols(m, to):                   # [r, c] -> [r, to]
        return jnp.pad(m, ((0, 0), (0, to - m.shape[1])))

    def pad_vec(v, to):                    # [c] -> [1, to]
        return jnp.pad(v, (0, to - v.shape[0]))[None, :]

    # Weights in bf16 (halves dominant HBM traffic, native MXU path);
    # shifts / bias stay f32.
    w1p = pad_cols(w1f, HID_PAD).astype(jnp.bfloat16)                       # [1536,128]
    t1p = pad_vec(t1, HID_PAD)                                              # [1,128] f32
    w2p = pad_cols(jnp.pad(w2f, ((0, HID_PAD - HID), (0, 0))),
                   HID_PAD).astype(jnp.bfloat16)                            # [128,128]
    t2p = pad_vec(t2, HID_PAD)
    w3p = pad_cols(jnp.pad(w3, ((0, HID_PAD - HID), (0, 0))),
                   HID_PAD).astype(jnp.bfloat16)                            # [128,128]
    b3p = pad_vec(b3, HID_PAD)

    return (w1p, t1p, w2p, t2p, w3p, b3p), raw


def reference_forward(x, raw):
    """Pure-JAX f32 reference of the PyTorch module (eval mode)."""
    def bn(h, gamma, beta, mean, var):
        return (h - mean) / jnp.sqrt(var + EPS) * gamma + beta

    h = x @ raw["w1"] + raw["b1"]
    h = jnp.maximum(bn(h, raw["gamma1"], raw["beta1"], raw["mean1"], raw["var1"]), 0.0)
    # Dropout is identity in eval mode.
    h = h @ raw["w2"] + raw["b2"]
    feat = jnp.maximum(bn(h, raw["gamma2"], raw["beta2"], raw["mean2"], raw["var2"]), 0.0)
    logits = feat @ raw["w3"] + raw["b3"]
    return logits, feat


if __name__ == "__main__":
    key = jax.random.PRNGKey(0)
    kx, kp = jax.random.split(key)

    B = 8
    x = jax.random.normal(kx, (B, IN_DIM), jnp.float32)   # [8, 1536]
    params, raw = make_params(kp)

    class_output, feature = man_classifier_forward(x, params)
    jax.block_until_ready((class_output, feature))

    assert class_output.shape == (B, NCLS)
    assert feature.shape == (B, HID)

    # Correctness check against the unfused f32 reference (bf16 weight tolerance).
    ref_logits, ref_feat = reference_forward(x, raw)
    np.testing.assert_allclose(np.asarray(feature), np.asarray(ref_feat),
                               atol=1e-1, rtol=1e-1)
    np.testing.assert_allclose(np.asarray(class_output), np.asarray(ref_logits),
                               atol=1e-1, rtol=1e-1)

    print("KERNEL_OK")
</pallas_src>

<mosaic_0001>
module attributes {stable_mosaic.version = 11 : i64} {
  func.func @man_classifier_kernel(%arg0: i32, %arg1: memref<8x1536xf32, #tpu.memory_space<vmem>>, %arg2: memref<1536x128xbf16, #tpu.memory_space<vmem>>, %arg3: memref<1x128xf32, #tpu.memory_space<vmem>>, %arg4: memref<128x128xbf16, #tpu.memory_space<vmem>>, %arg5: memref<1x128xf32, #tpu.memory_space<vmem>>, %arg6: memref<128x128xbf16, #tpu.memory_space<vmem>>, %arg7: memref<1x128xf32, #tpu.memory_space<vmem>>, %arg8: memref<8x128xf32, #tpu.memory_space<vmem>>, %arg9: memref<8x128xf32, #tpu.memory_space<vmem>>) attributes {dimension_semantics = [#tpu.dimension_semantics<parallel>], iteration_bounds = array<i64: 1>, scalar_prefetch = 0 : i64, scratch_operands = 0 : i64, tpu.core_type = #tpu.core_type<tc>, window_params = [{transform_indices = @transform_0, window_bounds = array<i64: 8, 1536>}, {pipeline_mode = #tpu.pipeline_mode<synchronous>, transform_indices = @transform_1, window_bounds = array<i64: 1536, 128>}, {pipeline_mode = #tpu.pipeline_mode<synchronous>, transform_indices = @transform_2, window_bounds = array<i64: 1, 128>}, {pipeline_mode = #tpu.pipeline_mode<synchronous>, transform_indices = @transform_3, window_bounds = array<i64: 128, 128>}, {pipeline_mode = #tpu.pipeline_mode<synchronous>, transform_indices = @transform_4, window_bounds = array<i64: 1, 128>}, {pipeline_mode = #tpu.pipeline_mode<synchronous>, transform_indices = @transform_5, window_bounds = array<i64: 128, 128>}, {pipeline_mode = #tpu.pipeline_mode<synchronous>, transform_indices = @transform_6, window_bounds = array<i64: 1, 128>}, {transform_indices = @transform_7, window_bounds = array<i64: 8, 128>}, {transform_indices = @transform_8, window_bounds = array<i64: 8, 128>}]} {
    %c0 = arith.constant 0 : index
    %c0_0 = arith.constant 0 : index
    %0 = vector.load %arg1[%c0, %c0_0] : memref<8x1536xf32, #tpu.memory_space<vmem>>, vector<8x1536xf32>
    %1 = arith.truncf %0 : vector<8x1536xf32> to vector<8x1536xbf16>
    %c0_1 = arith.constant 0 : index
    %c0_2 = arith.constant 0 : index
    %2 = vector.load %arg2[%c0_1, %c0_2] : memref<1536x128xbf16, #tpu.memory_space<vmem>>, vector<1536x128xbf16>
    %cst = arith.constant dense<0.000000e+00> : vector<8x128xf32>
    %3 = tpu.matmul %1, %2, %cst {dimension_numbers = #tpu.dot_dimension_numbers<[1], [0], [0], [1], [0, 0, 1, 1], [], []>} : vector<8x1536xbf16>, vector<1536x128xbf16>, vector<8x128xf32> -> vector<8x128xf32>
    %c0_3 = arith.constant 0 : index
    %c0_4 = arith.constant 0 : index
    %4 = vector.load %arg3[%c0_3, %c0_4] : memref<1x128xf32, #tpu.memory_space<vmem>>, vector<1x128xf32>
    %5 = vector.broadcast %4 : vector<1x128xf32> to vector<8x128xf32>
    %6 = arith.addf %3, %5 : vector<8x128xf32>
    %cst_5 = arith.constant 0.000000e+00 : f32
    %7 = vector.broadcast %cst_5 : f32 to vector<8x128xf32>
    %8 = arith.maximumf %6, %7 : vector<8x128xf32>
    %9 = arith.truncf %8 : vector<8x128xf32> to vector<8x128xbf16>
    %c0_6 = arith.constant 0 : index
    %c0_7 = arith.constant 0 : index
    %10 = vector.load %arg4[%c0_6, %c0_7] : memref<128x128xbf16, #tpu.memory_space<vmem>>, vector<128x128xbf16>
    %cst_8 = arith.constant dense<0.000000e+00> : vector<8x128xf32>
    %11 = tpu.matmul %9, %10, %cst_8 {dimension_numbers = #tpu.dot_dimension_numbers<[1], [0], [0], [1], [0, 0, 1, 1], [], []>} : vector<8x128xbf16>, vector<128x128xbf16>, vector<8x128xf32> -> vector<8x128xf32>
    %c0_9 = arith.constant 0 : index
    %c0_10 = arith.constant 0 : index
    %12 = vector.load %arg5[%c0_9, %c0_10] : memref<1x128xf32, #tpu.memory_space<vmem>>, vector<1x128xf32>
    %13 = vector.broadcast %12 : vector<1x128xf32> to vector<8x128xf32>
    %14 = arith.addf %11, %13 : vector<8x128xf32>
    %cst_11 = arith.constant 0.000000e+00 : f32
    %15 = vector.broadcast %cst_11 : f32 to vector<8x128xf32>
    %16 = arith.maximumf %14, %15 : vector<8x128xf32>
    %c0_12 = arith.constant 0 : index
    %c0_13 = arith.constant 0 : index
    %17 = vector.load %arg9[%c0_12, %c0_13] : memref<8x128xf32, #tpu.memory_space<vmem>>, vector<8x128xf32>
    tpu.vector_store %arg9[%c0_12, %c0_13], %16 {strides = array<i32>} : memref<8x128xf32, #tpu.memory_space<vmem>>, vector<8x128xf32>,
    %18 = arith.truncf %16 : vector<8x128xf32> to vector<8x128xbf16>
    %c0_14 = arith.constant 0 : index
    %c0_15 = arith.constant 0 : index
    %19 = vector.load %arg6[%c0_14, %c0_15] : memref<128x128xbf16, #tpu.memory_space<vmem>>, vector<128x128xbf16>
    %cst_16 = arith.constant dense<0.000000e+00> : vector<8x128xf32>
    %20 = tpu.matmul %18, %19, %cst_16 {dimension_numbers = #tpu.dot_dimension_numbers<[1], [0], [0], [1], [0, 0, 1, 1], [], []>} : vector<8x128xbf16>, vector<128x128xbf16>, vector<8x128xf32> -> vector<8x128xf32>
    %c0_17 = arith.constant 0 : index
    %c0_18 = arith.constant 0 : index
    %21 = vector.load %arg7[%c0_17, %c0_18] : memref<1x128xf32, #tpu.memory_space<vmem>>, vector<1x128xf32>
    %22 = vector.broadcast %21 : vector<1x128xf32> to vector<8x128xf32>
    %23 = arith.addf %20, %22 : vector<8x128xf32>
    %c0_19 = arith.constant 0 : index
    %c0_20 = arith.constant 0 : index
    %24 = vector.load %arg8[%c0_19, %c0_20] : memref<8x128xf32, #tpu.memory_space<vmem>>, vector<8x128xf32>
    tpu.vector_store %arg8[%c0_19, %c0_20], %23 {strides = array<i32>} : memref<8x128xf32, #tpu.memory_space<vmem>>, vector<8x128xf32>,
    return
  }
  func.func @transform_0(%arg0: i32) -> (i32, i32) {
    %c0_i32 = arith.constant 0 : i32
    %c0_i32_0 = arith.constant 0 : i32
    return %arg0, %c0_i32 : i32, i32
  }
  func.func @transform_1(%arg0: i32) -> (i32, i32) {
    %c0_i32 = arith.constant 0 : i32
    %c0_i32_0 = arith.constant 0 : i32
    %c0_i32_1 = arith.constant 0 : i32
    return %c0_i32, %c0_i32_0 : i32, i32
  }
  func.func @transform_2(%arg0: i32) -> (i32, i32) {
    %c0_i32 = arith.constant 0 : i32
    %c0_i32_0 = arith.constant 0 : i32
    %c0_i32_1 = arith.constant 0 : i32
    return %c0_i32, %c0_i32_0 : i32, i32
  }
  func.func @transform_3(%arg0: i32) -> (i32, i32) {
    %c0_i32 = arith.constant 0 : i32
    %c0_i32_0 = arith.constant 0 : i32
    %c0_i32_1 = arith.constant 0 : i32
    return %c0_i32, %c0_i32_0 : i32, i32
  }
  func.func @transform_4(%arg0: i32) -> (i32, i32) {
    %c0_i32 = arith.constant 0 : i32
    %c0_i32_0 = arith.constant 0 : i32
    %c0_i32_1 = arith.constant 0 : i32
    return %c0_i32, %c0_i32_0 : i32, i32
  }
  func.func @transform_5(%arg0: i32) -> (i32, i32) {
    %c0_i32 = arith.constant 0 : i32
    %c0_i32_0 = arith.constant 0 : i32
    %c0_i32_1 = arith.constant 0 : i32
    return %c0_i32, %c0_i32_0 : i32, i32
  }
  func.func @transform_6(%arg0: i32) -> (i32, i32) {
    %c0_i32 = arith.constant 0 : i32
    %c0_i32_0 = arith.constant 0 : i32
    %c0_i32_1 = arith.constant 0 : i32
    return %c0_i32, %c0_i32_0 : i32, i32
  }
  func.func @transform_7(%arg0: i32) -> (i32, i32) {
    %c0_i32 = arith.constant 0 : i32
    %c0_i32_0 = arith.constant 0 : i32
    return %arg0, %c0_i32 : i32, i32
  }
  func.func @transform_8(%arg0: i32) -> (i32, i32) {
    %c0_i32 = arith.constant 0 : i32
    %c0_i32_0 = arith.constant 0 : i32
    return %arg0, %c0_i32 : i32, i32
  }
}

</mosaic_0001>

<bundles_post_ra>
// kernel: tpu_custom_call.1
= control target key start
LH: loop header
LB: loop body
LE: loop exit
PB: predicated region body
PF: predicated region fallthrough
CT: control target
= control target key end

     0   :  { %14 = vsyncpa [#allocation3], 0  ;;  %s2051_s0 = inlined_call_operand.hbm [shape: f32[8,1536], index: 0, kind: input, shape index: {}]   ;;  %s2052_s1 = inlined_call_operand.hbm [shape: bf16[1536,128], index: 1, kind: input, shape index: {}]   ;;  %s2053_s2 = inlined_call_operand.vmem [shape: f32[1,128], index: 2, kind: input, shape index: {}]   ;;  %s2054_s3 = inlined_call_operand.hbm [shape: bf16[128,128], index: 3, kind: input, shape index: {}]   ;;  %s2055_s4 = inlined_call_operand.vmem [shape: f32[1,128], index: 4, kind: input, shape index: {}]   ;;  %s2056_s5 = inlined_call_operand.hbm [shape: bf16[128,128], index: 5, kind: input, shape index: {}]   ;;  %s2057_s6 = inlined_call_operand.vmem [shape: f32[1,128], index: 6, kind: input, shape index: {}]   ;;  %s2058_s7 = inlined_call_operand.hbm [shape: f32[8,128], index: 7, kind: output, shape index: {0}]   ;;  %s2059_s8 = inlined_call_operand.hbm [shape: f32[8,128], index: 8, kind: output, shape index: {1}]  }
   0x1   :  { %15 = vsyncpa [#allocation6], 0 }
   0x2   :  { %16 = vsyncpa [#allocation9], 0 }
   0x3   :  { %17 = vsyncpa [#allocation4], 0  ;;  %s34_s29 = sshll.u32 %s2052_s1, 4  ;;  %s35_s29 = int_to_ptr.hbm [resolvable:$true] %s34_s29 }
   0x4   :  { %18 = vsyncpa [#allocation12], 0  ;;  %s1971_s30 = smov [#allocation5]   ;;  %s24_s12 = sshll.u32 %s2051_s0, 4  ;;  %s25_s12 = int_to_ptr.hbm [resolvable:$true] %s24_s12 }
   0x5   :  { %s36_s9 = sshll.u32 %s1971_s30, 4  ;;  %s1972_s13 = smov 64   ;;  %s37_s9 = int_to_ptr.vmem [resolvable:$true] %s36_s9 }
   0x6   :  { %s1973_s14 = smov 4   ;;  %s1974_s15 = smov [#allocation2]  }
   0x7   :  { %42 = dma.hbm_to_vmem [thread:$0]  %s35_s29, 12288, %s37_s9, [#allocation6], %s1972_s13, %s1972_s13, %s1973_s14  }
   0x8   :  { %s26_s16 = sshll.u32 %s1974_s15, 4  ;;  %s49_s19 = sshll.u32 %s2054_s3, 4  ;;  %s27_s16 = int_to_ptr.vmem [resolvable:$true] %s26_s16  ;;  %s50_s19 = int_to_ptr.hbm [resolvable:$true] %s49_s19 }
   0x9   :  { %29 = dma.hbm_to_vmem [thread:$0]  %s25_s12, 1536, %s27_s16, [#allocation3]  }
   0xa   :  { %s64_s21 = sshll.u32 %s2056_s5, 4  ;;  %s1975_s22 = smov [#allocation7]   ;;  %s65_s21 = int_to_ptr.hbm [resolvable:$true] %s64_s21 }
   0xb   :  { %s51_s23 = sshll.u32 %s1975_s22, 4  ;;  %s1976_s0 = smov [#allocation8]   ;;  %s52_s23 = int_to_ptr.vmem [resolvable:$true] %s51_s23 }
   0xc   :  { %57 = dma.hbm_to_vmem [thread:$0]  %s50_s19, 1024, %s52_s23, [#allocation6], %s1972_s13, %s1972_s13, %s1973_s14  }
   0xd   :  { %s66_s24 = sshll.u32 %s1976_s0, 4  ;;  %s67_s24 = int_to_ptr.vmem [resolvable:$true] %s66_s24 }
   0xe   :  { %72 = dma.hbm_to_vmem [thread:$0]  %s65_s21, 1024, %s67_s24, [#allocation9], %s1972_s13, %s1972_s13, %s1973_s14  }
   0xf   :  { %1961 = dma.done.wait [#allocation3], 1536  }
  0x10   :  { %1962 = vsyncadd [#allocation3], 4294965760 }
  0x11   :  { %1963 = dma.done.wait [#allocation6], 13312  }
  0x12   :  { %1964 = vsyncadd [#allocation6], 4294953984 }
  0x13   :  { %1965 = dma.done.wait [#allocation9], 1024  }
  0x14   :  { %1966 = vsyncadd [#allocation9], 4294966272  ;;  %v1701_v0 = vld [vmem:[#allocation5 + $0x38] sm:$0xff]  ;;  %v1700_v4 = vld [vmem:[#allocation5 + $0x30] sm:$0xff]  ;;  %s1977_s26 = smov [#allocation11]   ;;  %s1229_s30 = sshll.u32 %s2059_s8, 4  ;;  %s1230_s30 = int_to_ptr.hbm [resolvable:$true] %s1229_s30 }
  0x15   :  { %v1709_v1 = vld [vmem:[#allocation5 + $0x78] sm:$0xff]  ;;  %887 = vmatpush.bf16.msra.mxu0 %v1701_v0  ;;  %v1708_v5 = vld [vmem:[#allocation5 + $0x70] sm:$0xff]  ;;  %v1699_v8 = vld [vmem:[#allocation5 + $0x28] sm:$0xff]  ;;  %s1227_s27 = sshll.u32 %s1977_s26, 4  ;;  %s1218_s14 = sshll.u32 %s2058_s7, 4  ;;  %s1228_s27 = int_to_ptr.vmem [resolvable:$true] %s1227_s27  ;;  %s1219_s14 = int_to_ptr.hbm [resolvable:$true] %s1218_s14 }
  0x16   :  { %v1717_v2 = vld [vmem:[#allocation5 + $0xb8] sm:$0xff]  ;;  %900 = vmatpush.bf16.msra.mxu1 %v1709_v1  ;;  %v1716_v6 = vld [vmem:[#allocation5 + $0xb0] sm:$0xff]  ;;  %v1707_v9 = vld [vmem:[#allocation5 + $0x68] sm:$0xff] }
  0x17   :  { %v1725_v3 = vld [vmem:[#allocation5 + $0xf8] sm:$0xff]  ;;  %913 = vmatpush.bf16.msra.mxu2 %v1717_v2  ;;  %v1724_v7 = vld [vmem:[#allocation5 + $0xf0] sm:$0xff]  ;;  %v1715_v10 = vld [vmem:[#allocation5 + $0xa8] sm:$0xff] }
  0x18   :  { %926 = vmatpush.bf16.msra.mxu3 %v1725_v3  ;;  %v1723_v11 = vld [vmem:[#allocation5 + $0xe8] sm:$0xff]  ;;  %v1698_v12 = vld [vmem:[#allocation5 + $0x20] sm:$0xff]  ;;  %v1697_v16 = vld [vmem:[#allocation5 + $0x18] sm:$0xff] }
  0x19   :  { %888 = vmatpush.bf16.msra.mxu0 %v1700_v4  ;;  %v1706_v13 = vld [vmem:[#allocation5 + $0x60] sm:$0xff]  ;;  %v1705_v17 = vld [vmem:[#allocation5 + $0x58] sm:$0xff]  ;;  %v1696_v20 = vld [vmem:[#allocation5 + $0x10] sm:$0xff] }
  0x1a   :  { %901 = vmatpush.bf16.msra.mxu1 %v1708_v5  ;;  %v1714_v14 = vld [vmem:[#allocation5 + $0xa0] sm:$0xff]  ;;  %v1713_v18 = vld [vmem:[#allocation5 + $0x98] sm:$0xff]  ;;  %v1704_v21 = vld [vmem:[#allocation5 + $0x50] sm:$0xff] }
  0x1b   :  { %914 = vmatpush.bf16.msra.mxu2 %v1716_v6  ;;  %v1722_v15 = vld [vmem:[#allocation5 + $0xe0] sm:$0xff]  ;;  %v1721_v19 = vld [vmem:[#allocation5 + $0xd8] sm:$0xff]  ;;  %v1712_v22 = vld [vmem:[#allocation5 + $0x90] sm:$0xff] }
  0x1c   :  { %927 = vmatpush.bf16.msra.mxu3 %v1724_v7  ;;  %v1720_v23 = vld [vmem:[#allocation5 + $0xd0] sm:$0xff]  ;;  %v1695_v24 = vld [vmem:[#allocation5 + $0x8] sm:$0xff]  ;;  %v1694_v28 = vld [vmem:[#allocation5] sm:$0xff] }
  0x1d   :  { %889 = vmatpush.bf16.msra.mxu0 %v1699_v8  ;;  %v1703_v25 = vld [vmem:[#allocation5 + $0x48] sm:$0xff]  ;;  %v1702_v29 = vld [vmem:[#allocation5 + $0x40] sm:$0xff]  ;;  %v1733_v32 = vld [vmem:[#allocation5 + $0x138] sm:$0xff] }
  0x1e   :  { %902 = vmatpush.bf16.msra.mxu1 %v1707_v9  ;;  %v1711_v26 = vld [vmem:[#allocation5 + $0x88] sm:$0xff]  ;;  %v1710_v30 = vld [vmem:[#allocation5 + $0x80] sm:$0xff]  ;;  %v93_v33 = vld [vmem:[#allocation2 + $0x10] sm:$0xff] }
  0x1f   :  { %915 = vmatpush.bf16.msra.mxu2 %v1715_v10  ;;  %v1719_v27 = vld [vmem:[#allocation5 + $0xc8] sm:$0xff]  ;;  %v1718_v31 = vld [vmem:[#allocation5 + $0xc0] sm:$0xff]  ;;  %v1741_v35 = vld [vmem:[#allocation5 + $0x178] sm:$0xff]  ;;  %v105_v40 = vpack.c.bf16 %v93_v33, %v93_v33 }
  0x20   :  { %928 = vmatpush.bf16.msra.mxu3 %v1723_v11  ;;  %v91_v34 = vld [vmem:[#allocation2] sm:$0xff]  ;;  %v94_v36 = vld [vmem:[#allocation2 + $0x18] sm:$0xff]  ;;  %v92_v37 = vld [vmem:[#allocation2 + $0x8] sm:$0xff] }
  0x21   :  { %890 = vmatpush.bf16.msra.mxu0 %v1698_v12  ;;  %v1749_v38 = vld [vmem:[#allocation5 + $0x1b8] sm:$0xff]  ;;  %v103_v41 = vpack.c.bf16 %v91_v34, %v91_v34  ;;  %v106_v42 = vpack.c.bf16 %v94_v36, %v94_v36  ;;  %v104_v43 = vpack.c.bf16 %v92_v37, %v92_v37  ;;  %v1732_v44 = vld [vmem:[#allocation5 + $0x130] sm:$0xff]  ;;  %v1731_v48 = vld [vmem:[#allocation5 + $0x128] sm:$0xff] }
  0x22   :  { %903 = vmatpush.bf16.msra.mxu1 %v1706_v13  ;;  %v1757_v39 = vld [vmem:[#allocation5 + $0x1f8] sm:$0xff]  ;;  %v1740_v45 = vld [vmem:[#allocation5 + $0x170] sm:$0xff]  ;;  %v1739_v49 = vld [vmem:[#allocation5 + $0x168] sm:$0xff] }
  0x23   :  { %916 = vmatpush.bf16.msra.mxu2 %v1714_v14  ;;  %v1748_v46 = vld [vmem:[#allocation5 + $0x1b0] sm:$0xff]  ;;  %v1747_v50 = vld [vmem:[#allocation5 + $0x1a8] sm:$0xff]  ;;  %v1730_v52 = vld [vmem:[#allocation5 + $0x120] sm:$0xff] }
  0x24   :  { %929 = vmatpush.bf16.msra.mxu3 %v1722_v15  ;;  %v1756_v47 = vld [vmem:[#allocation5 + $0x1f0] sm:$0xff]  ;;  %v1755_v51 = vld [vmem:[#allocation5 + $0x1e8] sm:$0xff]  ;;  %v1738_v53 = vld [vmem:[#allocation5 + $0x160] sm:$0xff] }
  0x25   :  { %891 = vmatpush.bf16.msra.mxu0 %v1697_v16  ;;  %v1746_v54 = vld [vmem:[#allocation5 + $0x1a0] sm:$0xff]  ;;  %v1729_v56 = vld [vmem:[#allocation5 + $0x118] sm:$0xff]  ;;  %v1728_v60 = vld [vmem:[#allocation5 + $0x110] sm:$0xff] }
  0x26   :  { %904 = vmatpush.bf16.msra.mxu1 %v1705_v17  ;;  %v1754_v55 = vld [vmem:[#allocation5 + $0x1e0] sm:$0xff]  ;;  %v1737_v57 = vld [vmem:[#allocation5 + $0x158] sm:$0xff]  ;;  %v1736_v61 = vld [vmem:[#allocation5 + $0x150] sm:$0xff] }
  0x27   :  { %917 = vmatpush.bf16.msra.mxu2 %v1713_v18  ;;  %v1745_v58 = vld [vmem:[#allocation5 + $0x198] sm:$0xff]  ;;  %v1744_v62 = vld [vmem:[#allocation5 + $0x190] sm:$0xff]  ;;  %v1727_v0 = vld [vmem:[#allocation5 + $0x108] sm:$0xff] }
  0x28   :  { %930 = vmatpush.bf16.msra.mxu3 %v1721_v19  ;;  %v1753_v59 = vld [vmem:[#allocation5 + $0x1d8] sm:$0xff]  ;;  %v1752_v63 = vld [vmem:[#allocation5 + $0x1d0] sm:$0xff]  ;;  %v1735_v1 = vld [vmem:[#allocation5 + $0x148] sm:$0xff] }
  0x29   :  { %892 = vmatpush.bf16.msra.mxu0 %v1696_v20  ;;  %v1743_v2 = vld [vmem:[#allocation5 + $0x188] sm:$0xff]  ;;  %v1726_v4 = vld [vmem:[#allocation5 + $0x100] sm:$0xff]  ;;  %v1765_v8 = vld [vmem:[#allocation5 + $0x238] sm:$0xff] }
  0x2a   :  { %905 = vmatpush.bf16.msra.mxu1 %v1704_v21  ;;  %v1751_v3 = vld [vmem:[#allocation5 + $0x1c8] sm:$0xff]  ;;  %v1734_v5 = vld [vmem:[#allocation5 + $0x140] sm:$0xff]  ;;  %v97_v9 = vld [vmem:[#allocation2 + $0x30] sm:$0xff] }
  0x2b   :  { %918 = vmatpush.bf16.msra.mxu2 %v1712_v22  ;;  %v1742_v6 = vld [vmem:[#allocation5 + $0x180] sm:$0xff]  ;;  %v1773_v11 = vld [vmem:[#allocation5 + $0x278] sm:$0xff]  ;;  %v96_v13 = vld [vmem:[#allocation2 + $0x28] sm:$0xff]  ;;  %v109_v16 = vpack.c.bf16 %v97_v9, %v97_v9 }
  0x2c   :  { %931 = vmatpush.bf16.msra.mxu3 %v1720_v23  ;;  %v1750_v7 = vld [vmem:[#allocation5 + $0x1c0] sm:$0xff]  ;;  %v98_v12 = vld [vmem:[#allocation2 + $0x38] sm:$0xff]  ;;  %v108_v19 = vpack.c.bf16 %v96_v13, %v96_v13  ;;  %v1764_v20 = vld [vmem:[#allocation5 + $0x230] sm:$0xff] }
  0x2d   :  { %893 = vmatpush.bf16.msra.mxu0 %v1695_v24  ;;  %v95_v10 = vld [vmem:[#allocation2 + $0x20] sm:$0xff]  ;;  %v1781_v14 = vld [vmem:[#allocation5 + $0x2b8] sm:$0xff]  ;;  %v110_v18 = vpack.c.bf16 %v98_v12, %v98_v12  ;;  %v1772_v21 = vld [vmem:[#allocation5 + $0x270] sm:$0xff] }
  0x2e   :  { %906 = vmatpush.bf16.msra.mxu1 %v1703_v25  ;;  %v1789_v15 = vld [vmem:[#allocation5 + $0x2f8] sm:$0xff]  ;;  %v107_v17 = vpack.c.bf16 %v95_v10, %v95_v10  ;;  %v1780_v22 = vld [vmem:[#allocation5 + $0x2b0] sm:$0xff]  ;;  %v1763_v24 = vld [vmem:[#allocation5 + $0x228] sm:$0xff] }
  0x2f   :  { %919 = vmatpush.bf16.msra.mxu2 %v1711_v26  ;;  %v1788_v23 = vld [vmem:[#allocation5 + $0x2f0] sm:$0xff]  ;;  %v1771_v25 = vld [vmem:[#allocation5 + $0x268] sm:$0xff]  ;;  %v1769_v33 = vld [vmem:[#allocation5 + $0x258] sm:$0xff] }
  0x30   :  { %932 = vmatpush.bf16.msra.mxu3 %v1719_v27  ;;  %v1779_v26 = vld [vmem:[#allocation5 + $0x2a8] sm:$0xff]  ;;  %v1777_v34 = vld [vmem:[#allocation5 + $0x298] sm:$0xff]  ;;  %v1760_v36 = vld [vmem:[#allocation5 + $0x210] sm:$0xff] }
  0x31   :  { %894 = vmatpush.bf16.msra.mxu0 %v1694_v28  ;;  %v1787_v27 = vld [vmem:[#allocation5 + $0x2e8] sm:$0xff]  ;;  %v1762_v28 = vld [vmem:[#allocation5 + $0x220] sm:$0xff]  ;;  %v1768_v37 = vld [vmem:[#allocation5 + $0x250] sm:$0xff] }
  0x32   :  { %907 = vmatpush.bf16.msra.mxu1 %v1702_v29  ;;  %v1770_v29 = vld [vmem:[#allocation5 + $0x260] sm:$0xff]  ;;  %v1791_v10 = vld [vmem:[#allocation7 + $0x8] sm:$0xff] }
  0x33   :  { %920 = vmatpush.bf16.msra.mxu2 %v1710_v30  ;;  %v1778_v30 = vld [vmem:[#allocation5 + $0x2a0] sm:$0xff] }
  0x34   :  { %933 = vmatpush.bf16.msra.mxu3 %v1718_v31  ;;  %895 = vmatmul.bf16.vlgmr.msra.gmra.mxu0 %v103_v41  ;;  %v1786_v31 = vld [vmem:[#allocation5 + $0x2e0] sm:$0xff]  ;;  %v1767_v41 = vld [vmem:[#allocation5 + $0x248] sm:$0xff] }
  0x35   :  { %939 = vmatpush.bf16.msrb.mxu0 %v1733_v32  ;;  %908 = vmatmul.bf16.vlgmr.msra.gmra.mxu1 %v104_v43  ;;  %v1761_v32 = vld [vmem:[#allocation5 + $0x218] sm:$0xff]  ;;  %v1783_v43 = vld [vmem:[#allocation5 + $0x2c8] sm:$0xff] }
  0x36   :  { %952 = vmatpush.bf16.msrb.mxu1 %v1741_v35  ;;  %921 = vmatmul.bf16.vlgmr.msra.gmra.mxu2 %v105_v40  ;;  %v1785_v35 = vld [vmem:[#allocation5 + $0x2d8] sm:$0xff]  ;;  %v1759_v40 = vld [vmem:[#allocation5 + $0x208] sm:$0xff] }
  0x37   :  { %965 = vmatpush.bf16.msrb.mxu2 %v1749_v38  ;;  %934 = vmatmul.bf16.vlgmr.msra.gmra.mxu3 %v106_v42  ;;  %v1776_v38 = vld [vmem:[#allocation5 + $0x290] sm:$0xff]  ;;  %v1775_v42 = vld [vmem:[#allocation5 + $0x288] sm:$0xff] }
  0x38   :  { %978 = vmatpush.bf16.msrb.mxu3 %v1757_v39  ;;  %v1784_v39 = vld [vmem:[#allocation5 + $0x2d0] sm:$0xff] }
  0x39   :  { %940 = vmatpush.bf16.msrb.mxu0 %v1732_v44  ;;  %v1758_v44 = vld [vmem:[#allocation5 + $0x200] sm:$0xff] }
  0x3a   :  { %953 = vmatpush.bf16.msrb.mxu1 %v1740_v45  ;;  %v1766_v45 = vld [vmem:[#allocation5 + $0x240] sm:$0xff] }
  0x3b   :  { %966 = vmatpush.bf16.msrb.mxu2 %v1748_v46  ;;  %v1774_v46 = vld [vmem:[#allocation5 + $0x280] sm:$0xff] }
  0x3c   :  { %979 = vmatpush.bf16.msrb.mxu3 %v1756_v47  ;;  %v99_v47 = vld [vmem:[#allocation2 + $0x40] sm:$0xff] }
  0x3d   :  { %941 = vmatpush.bf16.msrb.mxu0 %v1731_v48  ;;  %v100_v48 = vld [vmem:[#allocation2 + $0x48] sm:$0xff] }
  0x3e   :  { %954 = vmatpush.bf16.msrb.mxu1 %v1739_v49  ;;  %v1782_v49 = vld [vmem:[#allocation5 + $0x2c0] sm:$0xff] }
  0x3f   :  { %967 = vmatpush.bf16.msrb.mxu2 %v1747_v50  ;;  %v101_v50 = vld [vmem:[#allocation2 + $0x50] sm:$0xff] }
  0x40   :  { %980 = vmatpush.bf16.msrb.mxu3 %v1755_v51  ;;  %v102_v51 = vld [vmem:[#allocation2 + $0x58] sm:$0xff] }
  0x41   :  { %942 = vmatpush.bf16.msrb.mxu0 %v1730_v52  ;;  %v111_v52 = vpack.c.bf16 %v99_v47, %v99_v47  ;;  %v1815_v47 = vld [vmem:[%s2055_s4] ss:$0 sm:$0xff]  ;;  %s1978_s4 = smov [#allocation10]  }
  0x42   :  { %955 = vmatpush.bf16.msrb.mxu1 %v1738_v53  ;;  %v112_v53 = vpack.c.bf16 %v100_v48, %v100_v48  ;;  %s1216_s11 = sshll.u32 %s1978_s4, 4  ;;  %s1217_s11 = int_to_ptr.vmem [resolvable:$true] %s1216_s11 }
  0x43   :  { %968 = vmatpush.bf16.msrb.mxu2 %v1746_v54  ;;  %v113_v54 = vpack.c.bf16 %v101_v50, %v101_v50 }
  0x44   :  { %981 = vmatpush.bf16.msrb.mxu3 %v1754_v55  ;;  %v114_v55 = vpack.c.bf16 %v102_v51, %v102_v51 }
  0x45   :  { %943 = vmatpush.bf16.msrb.mxu0 %v1729_v56 }
  0x46   :  { %956 = vmatpush.bf16.msrb.mxu1 %v1737_v57 }
  0x47   :  { %969 = vmatpush.bf16.msrb.mxu2 %v1745_v58 }
  0x48   :  { %982 = vmatpush.bf16.msrb.mxu3 %v1753_v59 }
  0x49   :  { %944 = vmatpush.bf16.msrb.mxu0 %v1728_v60  ;;  %v1797_v60 = vld [vmem:[#allocation7 + $0x38] sm:$0xff] }
  0x4a   :  { %957 = vmatpush.bf16.msrb.mxu1 %v1736_v61 }
  0x4b   :  { %970 = vmatpush.bf16.msrb.mxu2 %v1744_v62 }
  0x4c   :  { %983 = vmatpush.bf16.msrb.mxu3 %v1752_v63  ;;  %v1796_v63 = vld [vmem:[#allocation7 + $0x30] sm:$0xff] }
  0x4d   :  { %945 = vmatpush.bf16.msrb.mxu0 %v1727_v0  ;;  %v1795_v0 = vld [vmem:[#allocation7 + $0x28] sm:$0xff] }
  0x4e   :  { %958 = vmatpush.bf16.msrb.mxu1 %v1735_v1 }
  0x4f   :  { %971 = vmatpush.bf16.msrb.mxu2 %v1743_v2 }
  0x50   :  { %984 = vmatpush.bf16.msrb.mxu3 %v1751_v3  ;;  %v1794_v3 = vld [vmem:[#allocation7 + $0x20] sm:$0xff] }
  0x51   :  { %946 = vmatpush.bf16.msrb.mxu0 %v1726_v4  ;;  %v1793_v4 = vld [vmem:[#allocation7 + $0x18] sm:$0xff] }
  0x52   :  { %959 = vmatpush.bf16.msrb.mxu1 %v1734_v5  ;;  %v1814_v5 = vld [vmem:[%s2053_s2] ss:$0 sm:$0xff] }
  0x53   :  { %972 = vmatpush.bf16.msrb.mxu2 %v1742_v6 }
  0x54   :  { %985 = vmatpush.bf16.msrb.mxu3 %v1750_v7  ;;  %947 = vmatmul.bf16.vlgmr.msrb.gmra.mxu0 %v107_v17  ;;  %v1792_v7 = vld [vmem:[#allocation7 + $0x10] sm:$0xff] }
  0x55   :  { %991 = vmatpush.bf16.msra.mxu0 %v1765_v8  ;;  %960 = vmatmul.bf16.vlgmr.msrb.gmra.mxu1 %v108_v19  ;;  %v1805_v19 = vld [vmem:[#allocation8 + $0x38] sm:$0xff] }
  0x56   :  { %1004 = vmatpush.bf16.msra.mxu1 %v1773_v11  ;;  %973 = vmatmul.bf16.vlgmr.msrb.gmra.mxu2 %v109_v16 }
  0x57   :  { %1017 = vmatpush.bf16.msra.mxu2 %v1781_v14  ;;  %986 = vmatmul.bf16.vlgmr.msrb.gmra.mxu3 %v110_v18 }
  0x58   :  { %1030 = vmatpush.bf16.msra.mxu3 %v1789_v15  ;;  %v1790_v15 = vld [vmem:[#allocation7] sm:$0xff] }
  0x59   :  { %992 = vmatpush.bf16.msra.mxu0 %v1764_v20 }
  0x5a   :  { %1005 = vmatpush.bf16.msra.mxu1 %v1772_v21 }
  0x5b   :  { %1018 = vmatpush.bf16.msra.mxu2 %v1780_v22  ;;  %v1804_v22 = vld [vmem:[#allocation8 + $0x30] sm:$0xff] }
  0x5c   :  { %1031 = vmatpush.bf16.msra.mxu3 %v1788_v23 }
  0x5d   :  { %993 = vmatpush.bf16.msra.mxu0 %v1763_v24  ;;  %v1803_v24 = vld [vmem:[#allocation8 + $0x28] sm:$0xff] }
  0x5e   :  { %1006 = vmatpush.bf16.msra.mxu1 %v1771_v25 }
  0x5f   :  { %1019 = vmatpush.bf16.msra.mxu2 %v1779_v26  ;;  %v1802_v26 = vld [vmem:[#allocation8 + $0x20] sm:$0xff] }
  0x60   :  { %1032 = vmatpush.bf16.msra.mxu3 %v1787_v27 }
  0x61   :  { %994 = vmatpush.bf16.msra.mxu0 %v1762_v28  ;;  %v1801_v28 = vld [vmem:[#allocation8 + $0x18] sm:$0xff] }
  0x62   :  { %1007 = vmatpush.bf16.msra.mxu1 %v1770_v29 }
  0x63   :  { %1020 = vmatpush.bf16.msra.mxu2 %v1778_v30 }
  0x64   :  { %1033 = vmatpush.bf16.msra.mxu3 %v1786_v31 }
  0x65   :  { %995 = vmatpush.bf16.msra.mxu0 %v1761_v32 }
  0x66   :  { %1008 = vmatpush.bf16.msra.mxu1 %v1769_v33  ;;  %v1800_v33 = vld [vmem:[#allocation8 + $0x10] sm:$0xff] }
  0x67   :  { %1021 = vmatpush.bf16.msra.mxu2 %v1777_v34 }
  0x68   :  { %1034 = vmatpush.bf16.msra.mxu3 %v1785_v35 }
  0x69   :  { %996 = vmatpush.bf16.msra.mxu0 %v1760_v36 }
  0x6a   :  { %1009 = vmatpush.bf16.msra.mxu1 %v1768_v37 }
  0x6b   :  { %1022 = vmatpush.bf16.msra.mxu2 %v1776_v38 }
  0x6c   :  { %1035 = vmatpush.bf16.msra.mxu3 %v1784_v39 }
  0x6d   :  { %997 = vmatpush.bf16.msra.mxu0 %v1759_v40 }
  0x6e   :  { %1010 = vmatpush.bf16.msra.mxu1 %v1767_v41 }
  0x6f   :  { %1023 = vmatpush.bf16.msra.mxu2 %v1775_v42 }
  0x70   :  { %1036 = vmatpush.bf16.msra.mxu3 %v1783_v43 }
  0x71   :  { %998 = vmatpush.bf16.msra.mxu0 %v1758_v44 }
  0x72   :  { %1011 = vmatpush.bf16.msra.mxu1 %v1766_v45  ;;  %v1799_v45 = vld [vmem:[#allocation8 + $0x8] sm:$0xff] }
  0x73   :  { %1024 = vmatpush.bf16.msra.mxu2 %v1774_v46  ;;  %v1798_v46 = vld [vmem:[#allocation8] sm:$0xff] }
  0x74   :  { %1037 = vmatpush.bf16.msra.mxu3 %v1782_v49  ;;  %999 = vmatmul.bf16.vlgmr.msra.gmra.mxu0 %v111_v52 }
  0x75   :  { %1012 = vmatmul.bf16.vlgmr.msra.gmra.mxu1 %v112_v53  ;;  %1113 = vmatpush.bf16.msrb.mxu0 %v1797_v60  ;;  %v1816_v53 = vld [vmem:[%s2057_s6] ss:$0 sm:$0xff] }
  0x76   :  { %1025 = vmatmul.bf16.vlgmr.msra.gmra.mxu2 %v113_v54  ;;  %1197 = vmatpush.bf16.msrb.mxu1 %v1805_v19 }
  0x77   :  { %1038 = vmatmul.bf16.vlgmr.msra.gmra.mxu3 %v114_v55 }
  0x79   :  { %1114 = vmatpush.bf16.msrb.mxu0 %v1796_v63 }
  0x7a   :  { %1198 = vmatpush.bf16.msrb.mxu1 %v1804_v22 }
  0x7d   :  { %1115 = vmatpush.bf16.msrb.mxu0 %v1795_v0 }
  0x7e   :  { %1199 = vmatpush.bf16.msrb.mxu1 %v1803_v24 }
  0x81   :  { %1116 = vmatpush.bf16.msrb.mxu0 %v1794_v3 }
  0x82   :  { %1200 = vmatpush.bf16.msrb.mxu1 %v1802_v26 }
  0x85   :  { %1117 = vmatpush.bf16.msrb.mxu0 %v1793_v4 }
  0x86   :  { %1201 = vmatpush.bf16.msrb.mxu1 %v1801_v28 }
  0x89   :  { %1118 = vmatpush.bf16.msrb.mxu0 %v1792_v7 }
  0x8a   :  { %1202 = vmatpush.bf16.msrb.mxu1 %v1800_v33 }
  0x8d   :  { %1119 = vmatpush.bf16.msrb.mxu0 %v1791_v10 }
  0x8e   :  { %1203 = vmatpush.bf16.msrb.mxu1 %v1799_v45 }
  0x91   :  { %1120 = vmatpush.bf16.msrb.mxu0 %v1790_v15 }
  0x92   :  { %1204 = vmatpush.bf16.msrb.mxu1 %v1798_v46 }
  0xb1   :  { %v896_v56 = vpop.f32.mrf.mxu0 }
  0xb2   :  { %v909_v57 = vpop.f32.mrf.mxu1  ;;  %v897_v8 = vadd.f32 %v1814_v5, %v896_v56 }
  0xb4   :  { %v910_v11 = vadd.f32 %v909_v57, %v897_v8 }
  0xb9   :  { %v922_v58 = vpop.f32.mrf.mxu2  ;;  %v898_v61 = vpop.f32.mrf.mxu0 }
  0xba   :  { %v935_v59 = vpop.f32.mrf.mxu3  ;;  %v911_v62 = vpop.f32.mrf.mxu1  ;;  %v923_v16 = vadd.f32 %v922_v58, %v910_v11 }
  0xbc   :  { %v936_v18 = vadd.f32 %v935_v59, %v923_v16 }
  0xc1   :  { %v924_v1 = vpop.f32.mrf.mxu2 }
  0xc2   :  { %v937_v2 = vpop.f32.mrf.mxu3 }
  0xd1   :  { %v948_v6 = vpop.f32.mrf.mxu0 }
  0xd2   :  { %v961_v9 = vpop.f32.mrf.mxu1  ;;  %v949_v23 = vadd.f32 %v948_v6, %v936_v18 }
  0xd4   :  { %v962_v25 = vadd.f32 %v961_v9, %v949_v23 }
  0xd9   :  { %v974_v12 = vpop.f32.mrf.mxu2  ;;  %v950_v14 = vpop.f32.mrf.mxu0 }
  0xda   :  { %v987_v13 = vpop.f32.mrf.mxu3  ;;  %v963_v17 = vpop.f32.mrf.mxu1  ;;  %v975_v27 = vadd.f32 %v974_v12, %v962_v25 }
  0xdc   :  { %v988_v29 = vadd.f32 %v987_v13, %v975_v27 }
  0xe1   :  { %v976_v20 = vpop.f32.mrf.mxu2 }
  0xe2   :  { %v989_v21 = vpop.f32.mrf.mxu3 }
  0xf1   :  { %v1000_v30 = vpop.f32.mrf.mxu0 }
  0xf2   :  { %v1013_v31 = vpop.f32.mrf.mxu1  ;;  %v1001_v32 = vadd.f32 %v1000_v30, %v988_v29 }
  0xf4   :  { %v1014_v34 = vadd.f32 %v1013_v31, %v1001_v32 }
  0xf9   :  { %v1026_v35 = vpop.f32.mrf.mxu2  ;;  %v1002_v38 = vpop.f32.mrf.mxu0 }
  0xfa   :  { %v1039_v36 = vpop.f32.mrf.mxu3  ;;  %v1027_v37 = vadd.f32 %v1026_v35, %v1014_v34  ;;  %v1015_v39 = vpop.f32.mrf.mxu1 }
  0xfc   :  { %v1040_v40 = vadd.f32 %v1039_v36, %v1027_v37 }
  0xfe   :  { %v1043_v41 = vmax.f32 %v1040_v40, 0.0 }
 0x100   :  { %v1044_v42 = vpack.c.bf16 %v1043_v41, %v1043_v41 }
 0x101   :  { %v1028_v43 = vpop.f32.mrf.mxu2 }
 0x102   :  { %v1041_v44 = vpop.f32.mrf.mxu3  ;;  %1121 = vmatmul.bf16.vlgmr.msrb.gmra.mxu0 %v1044_v42 }
 0x17f   :  { %v1122_v48 = vpop.f32.mrf.mxu0 }
 0x180   :  { %v1123_v49 = vadd.f32 %v1815_v47, %v1122_v48 }
 0x182   :  { %v1126_v50 = vmax.f32 %v1123_v49, 0.0 }
 0x184   :  { %1127 = vst [vmem:[#allocation11] sm:$0xff] %v1126_v50  ;;  %v1128_v51 = vpack.c.bf16 %v1126_v50, %v1126_v50 }
 0x185   :  { %1232 = dma.vmem_to_hbm [thread:$0]  %s1228_s27, 128, %s1230_s30, [#allocation12]  }
 0x186   :  { %1205 = vmatmul.bf16.vlgmr.msrb.gmra.mxu1 %v1128_v51 }
 0x187   :  { %v1124_v52 = vpop.f32.mrf.mxu0 }
 0x203   :  { %v1206_v54 = vpop.f32.mrf.mxu1 }
 0x204   :  { %v1207_v55 = vadd.f32 %v1816_v53, %v1206_v54 }
 0x206   :  { %1210 = vst [vmem:[#allocation10] sm:$0xff] %v1207_v55 }
 0x207   :  { %1221 = dma.vmem_to_hbm [thread:$0]  %s1217_s11, 128, %s1219_s14, [#allocation4]  }
 0x20b   :  { %v1208_v56 = vpop.f32.mrf.mxu1 }
 0x20c   :  { %1967 = dma.done.wait [#allocation4], 128  }
 0x20d   :  { %1968 = vsyncadd [#allocation4], 4294967168 }
 0x20e   :  { %1969 = dma.done.wait [#allocation12], 128  }
 0x20f   :  { %1970 = vsyncadd [#allocation12], 4294967168 }
 0x210   :  { %1241 = vsyncpa [#allocation3], 1 }
 0x211   :  { %1242 = vsyncpa [#allocation6], 1 }
 0x212   :  { %1243 = vsyncpa [#allocation9], 1 }
 0x213   :  { %1244 = vsyncpa [#allocation4], 1 }
 0x214   :  { %1245 = vsyncpa [#allocation12], 1 }

</bundles_post_ra>
